<compile_context>
chip_gen: v7x
topology: tpu7x:2x2x1
jax: 0.10.0
libtpu: 0.0.40
codegen_flags: <defaults>
</compile_context>

<pallas_src>
import jax
import jax.numpy as jnp
from jax import lax
from jax.experimental import pallas as pl
from jax.experimental.pallas import tpu as pltpu


def _round_up(x, m):
    return ((x + m - 1) // m) * m


def mean_agg_kernel(idx_ref, inv_ref, table_ref, out_ref, acc_ref):
    """One (node-tile, entity-tile) step of out = mask @ table.

    idx_ref:   (tN, K)  int32    sampled de-duplicated neighbor ids, -1 = pad
    inv_ref:   (tN, 1)  f32      1 / num_sampled_neighbors (0 for padded rows)
    table_ref: (tE, Dp) f32/bf16 embedding-table tile (entities e*tE .. )
    out_ref:   (tN, Dp) f32      aggregated output tile
    acc_ref:   (tN, Dp) f32      VMEM accumulator, persists across the E axis
    """
    e = pl.program_id(1)

    @pl.when(e == 0)
    def _():
        acc_ref[...] = jnp.zeros_like(acc_ref)

    tN, K = idx_ref.shape
    tE = table_ref.shape[0]

    # Global entity ids covered by this table tile (single hoisted 2-D iota).
    ent = lax.broadcasted_iota(jnp.int32, (tN, tE), 1) + e * tE

    # Set-membership mask for this tile, built with a short static loop over
    # the K sample slots — no (K, tN, tE) intermediate is ever materialized.
    # Boolean OR keeps it a 0/1 set mask (matches the PyTorch set() dedup) and
    # is the cheapest VPU path; padded slots (-1) never match any entity id.
    idx = idx_ref[...]                                     # (tN, K) int32
    member = idx[:, 0:1] == ent                            # (tN, tE) bool
    for k in range(1, K):                                  # K small & static
        member = jnp.logical_or(member, idx[:, k:k + 1] == ent)

    # MXU: (tN, tE) @ (tE, Dp). Cast membership to the streamed table dtype
    # only here (bf16 table => native-rate MXU on v6e/v7x; 0/1 values exact).
    acc_ref[...] += jnp.dot(member.astype(table_ref.dtype), table_ref[...],
                            preferred_element_type=jnp.float32)

    @pl.when(e == pl.num_programs(1) - 1)
    def _():
        out_ref[...] = (acc_ref[...] * inv_ref[...]).astype(out_ref.dtype)


def mean_aggregate(samp_idx, num_neigh, embed_table, *, compute_dtype=None,
                   max_tile_n=128, max_tile_e=512):
    """samp_idx: (N, K) int32 (pad = -1); num_neigh: (N,); table: (E, D)."""
    N, K = samp_idx.shape
    E, D = embed_table.shape

    # Lane-dense output / table tiles: pad D up to a multiple of 128.
    Dp = _round_up(D, 128)
    # Node tile (sublane axis) and entity tile (contraction axis); caps chosen
    # to fit v7x's 64 MiB VMEM (2 table buffers + membership + accumulator).
    tN = max_tile_n if N > max_tile_n else _round_up(N, 8)
    Np = _round_up(N, tN)
    tE = max_tile_e if E > max_tile_e else _round_up(E, 8)
    Ep = _round_up(E, tE)

    table = embed_table if compute_dtype is None else embed_table.astype(
        compute_dtype)
    table_p = jnp.pad(table, ((0, Ep - E), (0, Dp - D)))
    idx_p = jnp.pad(samp_idx.astype(jnp.int32), ((0, Np - N), (0, 0)),
                    constant_values=-1)
    inv = jnp.where(num_neigh > 0,
                    1.0 / jnp.maximum(num_neigh, 1).astype(jnp.float32), 0.0)
    inv_p = jnp.pad(inv, (0, Np - N)).reshape(Np, 1)

    grid = (Np // tN, Ep // tE)
    table_bytes = Ep * Dp * table_p.dtype.itemsize

    out = pl.pallas_call(
        mean_agg_kernel,
        out_shape=jax.ShapeDtypeStruct((Np, Dp), jnp.float32),
        grid_spec=pltpu.PrefetchScalarGridSpec(
            num_scalar_prefetch=0,
            grid=grid,
            in_specs=[
                pl.BlockSpec((tN, K), lambda n, e: (n, 0)),
                pl.BlockSpec((tN, 1), lambda n, e: (n, 0)),
                pl.BlockSpec((tE, Dp), lambda n, e: (e, 0)),
            ],
            out_specs=pl.BlockSpec((tN, Dp), lambda n, e: (n, 0)),
            scratch_shapes=[pltpu.VMEM((tN, Dp), jnp.float32)],
        ),
        compiler_params=pltpu.CompilerParams(
            dimension_semantics=("parallel", "arbitrary"),
            vmem_limit_bytes=32 * 1024 * 1024,
        ),
        cost_estimate=pl.CostEstimate(
            flops=2 * Np * Ep * Dp,
            transcendentals=0,
            bytes_accessed=grid[0] * table_bytes + Np * K * 4 + Np * Dp * 4,
        ),
    )(idx_p, inv_p, table_p)
    return out[:N, :D]


def sample_neighbors(key, neighs, neigh_counts, keep_prob, max_keep):
    """Deterministic JAX stand-in for the module's set()/random.sample glue.

    neighs:       (N, max_neighs) int32 padded neighbor lists (no dups per row)
    neigh_counts: (N,)            int32 valid length of each list
    Returns:
      samp_idx:  (N, max_keep) int32 distinct sampled neighbor ids, -1 = pad
      num_neigh: (N,)          int32 = min(ceil(len * keep_prob), max_keep)
                               (0 for zero-degree nodes -> zero output row)
    """
    N, max_neighs = neighs.shape
    m = jnp.minimum(
        jnp.ceil(neigh_counts.astype(jnp.float32) * keep_prob).astype(jnp.int32),
        max_keep)
    scores = jax.random.uniform(key, (N, max_neighs))
    valid = jnp.arange(max_neighs)[None, :] < neigh_counts[:, None]
    scores = jnp.where(valid, scores, jnp.inf)     # invalid slots sort last
    order = jnp.argsort(scores, axis=1)            # random order of valid slots
    perm = jnp.take_along_axis(neighs, order, axis=1)
    if max_keep > max_neighs:
        perm = jnp.pad(perm, ((0, 0), (0, max_keep - max_neighs)),
                       constant_values=-1)
    keep = jnp.arange(max_keep)[None, :] < m[:, None]
    samp = jnp.where(keep, perm[:, :max_keep], -1).astype(jnp.int32)
    return samp, m


if __name__ == "__main__":
    # Small deterministic synthetic setup.
    num_nodes, num_entities, embed_dim = 16, 64, 32
    max_neighs, max_keep, keep_prob = 10, 8, 0.5

    key = jax.random.PRNGKey(0)
    k_tab, k_nbr, k_cnt, k_smp = jax.random.split(key, 4)

    # "features" parameter: embedding table (like nn.Embedding / EmbeddingBag).
    embed_table = jax.random.normal(k_tab, (num_entities, embed_dim),
                                    dtype=jnp.float32)

    # Duplicate-free padded neighbor lists + per-node valid counts.
    nbr_keys = jax.random.split(k_nbr, num_nodes)
    neighs = jax.vmap(
        lambda kk: jax.random.permutation(kk, num_entities)[:max_neighs]
    )(nbr_keys).astype(jnp.int32)
    neigh_counts = jax.random.randint(k_cnt, (num_nodes,), 1, max_neighs + 1,
                                      dtype=jnp.int32)

    # Neighbor dropout / sampling (glue, deterministic via PRNGKey).
    samp_idx, num_neigh = sample_neighbors(k_smp, neighs, neigh_counts,
                                           keep_prob, max_keep)

    # Pallas kernel, f32 table.
    out = jax.block_until_ready(
        mean_aggregate(samp_idx, num_neigh, embed_table))

    # Pure-JAX reference: row-normalized membership mask @ table.
    valid = samp_idx >= 0
    gathered = jnp.where(valid[..., None],
                         embed_table[jnp.where(valid, samp_idx, 0)], 0.0)
    ref = gathered.sum(axis=1) / jnp.maximum(num_neigh, 1)[:, None].astype(
        jnp.float32)

    assert out.shape == (num_nodes, embed_dim)
    assert jnp.allclose(out, ref, atol=1e-5, rtol=1e-5)

    # bf16 table streaming (native-rate MXU on v6e/v7x); looser tolerance.
    out_bf16 = jax.block_until_ready(
        mean_aggregate(samp_idx, num_neigh, embed_table,
                       compute_dtype=jnp.bfloat16))
    assert jnp.allclose(out_bf16, ref, atol=3e-2, rtol=3e-2)

    print("KERNEL_OK")
</pallas_src>

<mosaic_0001>
module attributes {stable_mosaic.version = 11 : i64} {
  func.func @mean_agg_kernel(%arg0: i32, %arg1: i32, %arg2: memref<16x8xi32, #tpu.memory_space<vmem>>, %arg3: memref<16x1xf32, #tpu.memory_space<vmem>>, %arg4: memref<64x128xf32, #tpu.memory_space<vmem>>, %arg5: memref<16x128xf32, #tpu.memory_space<vmem>>, %arg6: memref<16x128xf32, #tpu.memory_space<vmem>>) attributes {dimension_semantics = [#tpu.dimension_semantics<parallel>, #tpu.dimension_semantics<arbitrary>], iteration_bounds = array<i64: 1, 1>, scalar_prefetch = 0 : i64, scratch_operands = 1 : i64, tpu.core_type = #tpu.core_type<tc>, window_params = [{transform_indices = @transform_0, window_bounds = array<i64: 16, 8>}, {transform_indices = @transform_1, window_bounds = array<i64: 16, 1>}, {transform_indices = @transform_2, window_bounds = array<i64: 64, 128>}, {transform_indices = @transform_3, window_bounds = array<i64: 16, 128>}]} {
    %c0_i32 = arith.constant 0 : i32
    %0 = arith.cmpi eq, %arg1, %c0_i32 : i32
    %1 = arith.extui %0 : i1 to i32
    %c0_i32_0 = arith.constant 0 : i32
    %2 = arith.cmpi ne, %1, %c0_i32_0 : i32
    scf.if %2 {
      %cst_10 = arith.constant 0.000000e+00 : f32
      %49 = vector.broadcast %cst_10 : f32 to vector<16x128xf32>
      %c0_11 = arith.constant 0 : index
      %c0_12 = arith.constant 0 : index
      %50 = vector.load %arg6[%c0_11, %c0_12] : memref<16x128xf32, #tpu.memory_space<vmem>>, vector<16x128xf32>
      tpu.vector_store %arg6[%c0_11, %c0_12], %49 {strides = array<i32>} : memref<16x128xf32, #tpu.memory_space<vmem>>, vector<16x128xf32>,
    } else {
    }
    %3 = tpu.iota {dimensions = array<i32: 1>} : vector<16x64xi32>
    %c64_i32 = arith.constant 64 : i32
    %4 = arith.muli %arg1, %c64_i32 : i32
    %5 = vector.broadcast %4 : i32 to vector<16x64xi32>
    %6 = arith.addi %3, %5 : vector<16x64xi32>
    %c0 = arith.constant 0 : index
    %c0_1 = arith.constant 0 : index
    %7 = vector.load %arg2[%c0, %c0_1] : memref<16x8xi32, #tpu.memory_space<vmem>>, vector<16x8xi32>
    %8 = vector.extract_strided_slice %7 {offsets = [0, 0], sizes = [16, 1], strides = [1, 1]} : vector<16x8xi32> to vector<16x1xi32>
    %9 = vector.broadcast %8 : vector<16x1xi32> to vector<16x64xi32>
    %10 = arith.cmpi eq, %9, %6 : vector<16x64xi32>
    %11 = vector.extract_strided_slice %7 {offsets = [0, 1], sizes = [16, 1], strides = [1, 1]} : vector<16x8xi32> to vector<16x1xi32>
    %12 = vector.broadcast %11 : vector<16x1xi32> to vector<16x64xi32>
    %13 = arith.cmpi eq, %12, %6 : vector<16x64xi32>
    %14 = arith.ori %10, %13 : vector<16x64xi1>
    %15 = vector.extract_strided_slice %7 {offsets = [0, 2], sizes = [16, 1], strides = [1, 1]} : vector<16x8xi32> to vector<16x1xi32>
    %16 = vector.broadcast %15 : vector<16x1xi32> to vector<16x64xi32>
    %17 = arith.cmpi eq, %16, %6 : vector<16x64xi32>
    %18 = arith.ori %14, %17 : vector<16x64xi1>
    %19 = vector.extract_strided_slice %7 {offsets = [0, 3], sizes = [16, 1], strides = [1, 1]} : vector<16x8xi32> to vector<16x1xi32>
    %20 = vector.broadcast %19 : vector<16x1xi32> to vector<16x64xi32>
    %21 = arith.cmpi eq, %20, %6 : vector<16x64xi32>
    %22 = arith.ori %18, %21 : vector<16x64xi1>
    %23 = vector.extract_strided_slice %7 {offsets = [0, 4], sizes = [16, 1], strides = [1, 1]} : vector<16x8xi32> to vector<16x1xi32>
    %24 = vector.broadcast %23 : vector<16x1xi32> to vector<16x64xi32>
    %25 = arith.cmpi eq, %24, %6 : vector<16x64xi32>
    %26 = arith.ori %22, %25 : vector<16x64xi1>
    %27 = vector.extract_strided_slice %7 {offsets = [0, 5], sizes = [16, 1], strides = [1, 1]} : vector<16x8xi32> to vector<16x1xi32>
    %28 = vector.broadcast %27 : vector<16x1xi32> to vector<16x64xi32>
    %29 = arith.cmpi eq, %28, %6 : vector<16x64xi32>
    %30 = arith.ori %26, %29 : vector<16x64xi1>
    %31 = vector.extract_strided_slice %7 {offsets = [0, 6], sizes = [16, 1], strides = [1, 1]} : vector<16x8xi32> to vector<16x1xi32>
    %32 = vector.broadcast %31 : vector<16x1xi32> to vector<16x64xi32>
    %33 = arith.cmpi eq, %32, %6 : vector<16x64xi32>
    %34 = arith.ori %30, %33 : vector<16x64xi1>
    %35 = vector.extract_strided_slice %7 {offsets = [0, 7], sizes = [16, 1], strides = [1, 1]} : vector<16x8xi32> to vector<16x1xi32>
    %36 = vector.broadcast %35 : vector<16x1xi32> to vector<16x64xi32>
    %37 = arith.cmpi eq, %36, %6 : vector<16x64xi32>
    %38 = arith.ori %34, %37 : vector<16x64xi1>
    %c0_2 = arith.constant 0 : index
    %c0_3 = arith.constant 0 : index
    %39 = vector.load %arg6[%c0_2, %c0_3] : memref<16x128xf32, #tpu.memory_space<vmem>>, vector<16x128xf32>
    %40 = arith.extui %38 : vector<16x64xi1> to vector<16x64xi32>
    %41 = arith.sitofp %40 : vector<16x64xi32> to vector<16x64xf32>
    %c0_4 = arith.constant 0 : index
    %c0_5 = arith.constant 0 : index
    %42 = vector.load %arg4[%c0_4, %c0_5] : memref<64x128xf32, #tpu.memory_space<vmem>>, vector<64x128xf32>
    %cst = arith.constant dense<0.000000e+00> : vector<16x128xf32>
    %43 = tpu.matmul %41, %42, %cst {dimension_numbers = #tpu.dot_dimension_numbers<[1], [0], [0], [1], [0, 0, 1, 1], [], []>} : vector<16x64xf32>, vector<64x128xf32>, vector<16x128xf32> -> vector<16x128xf32>
    %44 = arith.addf %39, %43 : vector<16x128xf32>
    %c0_6 = arith.constant 0 : index
    %c0_7 = arith.constant 0 : index
    %45 = vector.load %arg6[%c0_6, %c0_7] : memref<16x128xf32, #tpu.memory_space<vmem>>, vector<16x128xf32>
    tpu.vector_store %arg6[%c0_6, %c0_7], %44 {strides = array<i32>} : memref<16x128xf32, #tpu.memory_space<vmem>>, vector<16x128xf32>,
    %c0_i32_8 = arith.constant 0 : i32
    %46 = arith.cmpi eq, %arg1, %c0_i32_8 : i32
    %47 = arith.extui %46 : i1 to i32
    %c0_i32_9 = arith.constant 0 : i32
    %48 = arith.cmpi ne, %47, %c0_i32_9 : i32
    scf.if %48 {
      %c0_10 = arith.constant 0 : index
      %c0_11 = arith.constant 0 : index
      %49 = vector.load %arg6[%c0_10, %c0_11] : memref<16x128xf32, #tpu.memory_space<vmem>>, vector<16x128xf32>
      %c0_12 = arith.constant 0 : index
      %c0_13 = arith.constant 0 : index
      %50 = vector.load %arg3[%c0_12, %c0_13] : memref<16x1xf32, #tpu.memory_space<vmem>>, vector<16x1xf32>
      %51 = vector.broadcast %50 : vector<16x1xf32> to vector<16x128xf32>
      %52 = arith.mulf %49, %51 : vector<16x128xf32>
      %c0_14 = arith.constant 0 : index
      %c0_15 = arith.constant 0 : index
      %53 = vector.load %arg5[%c0_14, %c0_15] : memref<16x128xf32, #tpu.memory_space<vmem>>, vector<16x128xf32>
      tpu.vector_store %arg5[%c0_14, %c0_15], %52 {strides = array<i32>} : memref<16x128xf32, #tpu.memory_space<vmem>>, vector<16x128xf32>,
    } else {
    }
    return
  }
  func.func @transform_0(%arg0: i32, %arg1: i32) -> (i32, i32) {
    %c0_i32 = arith.constant 0 : i32
    %c0_i32_0 = arith.constant 0 : i32
    return %arg0, %c0_i32 : i32, i32
  }
  func.func @transform_1(%arg0: i32, %arg1: i32) -> (i32, i32) {
    %c0_i32 = arith.constant 0 : i32
    %c0_i32_0 = arith.constant 0 : i32
    return %arg0, %c0_i32 : i32, i32
  }
  func.func @transform_2(%arg0: i32, %arg1: i32) -> (i32, i32) {
    %c0_i32 = arith.constant 0 : i32
    %c0_i32_0 = arith.constant 0 : i32
    return %arg1, %c0_i32 : i32, i32
  }
  func.func @transform_3(%arg0: i32, %arg1: i32) -> (i32, i32) {
    %c0_i32 = arith.constant 0 : i32
    %c0_i32_0 = arith.constant 0 : i32
    return %arg0, %c0_i32 : i32, i32
  }
}

</mosaic_0001>

<bundles_post_ra>
// kernel: tpu_custom_call.1
= control target key start
LH: loop header
LB: loop body
LE: loop exit
PB: predicated region body
PF: predicated region fallthrough
CT: control target
= control target key end

     0   :  { %8 = vsyncpa [#allocation4], 0  ;;  %s461_s0 = inlined_call_operand.vmem [shape: s32[16,8], index: 0, kind: input, shape index: {}]   ;;  %s462_s1 = inlined_call_operand.vmem [shape: f32[16,1], index: 1, kind: input, shape index: {}]   ;;  %s463_s2 = inlined_call_operand.hbm [shape: f32[64,128], index: 2, kind: input, shape index: {}]   ;;  %s464_s3 = inlined_call_operand.hbm [shape: f32[16,128], index: 3, kind: output, shape index: {}]  }
   0x1   :  { %9 = vsyncpa [#allocation5], 0  ;;  %s384_s12 = smov [#allocation3]   ;;  %s336_s16 = scalar_lea.hbm %s463_s2, 1024 }
   0x2   :  { %s19_s13 = sshll.u32 %s384_s12, 4  ;;  %p337_p0 = scmp.ne.s32.totalorder %s463_s2, %s336_s16  ;;  %s20_s13 = int_to_ptr.vmem [resolvable:$true] %s19_s13 }
   0x3   :  { %p340_p1 = scmp.lt.u32.totalorder %s336_s16, %s463_s2 }
   0x5   :  { %p342_p2 = pnand %p340_p1, %p337_p0 }
   0x7   :  { %345 = shalt.err (!%p342_p2)
}
   0x8   :  { %s346_s21 = scalar_lea.vmem %s20_s13, 1024  ;;  %p351_p4 = scmp.lt.s32.totalorder %s20_s13, %s20_s13 }
   0x9   :  { %p347_p3 = scmp.ne.s32.totalorder %s20_s13, %s346_s21  ;;  %p352_p5 = scmp.lt.s32.totalorder %s346_s21, %s346_s21 }
   0xb   :  { %p353_p6 = por %p352_p5, %p351_p4 }
   0xd   :  { %p354_p7 = pnand %p353_p6, %p347_p3 }
   0xf   :  { %357 = shalt.err (!%p354_p7)
}
  0x10   :  { %s385_s22 = smov 128   ;;  %s386_s23 = smov 8  }
  0x11   :  { %25 = dma.hbm_to_vmem [thread:$0]  %s463_s2, 1024, %s20_s13, [#allocation4], %s385_s22, %s385_s22, %s386_s23  }
  0x12   :  { %380 = dma.done.wait [#allocation4], 1024  }
  0x13   :  { %381 = vsyncadd [#allocation4], 4294966272  ;;  %v387_v0 = vmov 0   ;;  %v41_v1 = vld [vmem:[%s461_s0 + $0x8] sm:$0xff]  ;;  %v40_v2 = vld [vmem:[%s461_s0] sm:$0xff]  ;;  %v388_v3 = vmov 1   ;;  %v35_v30 = vlaneseq }
  0x14   :  { %322 = vset.pattern.permute.xlu1 %v387_v0  ;;  %320 = vset.pattern.permute.xlu0 %v387_v0  ;;  %v389_v4 = vmov 2   ;;  %v390_v5 = vmov 3   ;;  %v391_v6 = vmov 4   ;;  %v392_v7 = vmov 5   ;;  %v126_v9 = vld [vmem:[#allocation3] sm:$0xff]  ;;  %v127_v10 = vld [vmem:[#allocation3 + $0x8] sm:$0xff] }
  0x15   :  { %46 = vperm.xlu1 %322, %v41_v1   ;;  %43 = vperm.xlu0 %320, %v40_v2   ;;  %v393_v8 = vmov 7   ;;  %v291_v11 = vpack.c.bf16 %v127_v10, %v126_v9  ;;  %v128_v12 = vld [vmem:[#allocation3 + $0x10] sm:$0xff]  ;;  %v129_v13 = vld [vmem:[#allocation3 + $0x18] sm:$0xff]  ;;  %v394_v14 = vmov 6   ;;  %v130_v16 = vld [vmem:[#allocation3 + $0x20] sm:$0xff]  ;;  %v36_v33 = vand.u32 127, %v35_v30 }
  0x16   :  { %v295_v15 = vpack.c.bf16 %v129_v13, %v128_v12  ;;  %v131_v17 = vld [vmem:[#allocation3 + $0x28] sm:$0xff]  ;;  %v132_v19 = vld [vmem:[#allocation3 + $0x30] sm:$0xff]  ;;  %v133_v20 = vld [vmem:[#allocation3 + $0x38] sm:$0xff]  ;;  %v395_v41 = vmov 0.0  }
  0x17   :  { %292 = vmatprep.subr.bf16.mxu0 %v291_v11  ;;  %v299_v18 = vpack.c.bf16 %v131_v17, %v130_v16  ;;  %v303_v21 = vpack.c.bf16 %v133_v20, %v132_v19  ;;  %v226_v22 = vld [vmem:[%s462_s1 + $0x8] sm:$0xff]  ;;  %v225_v23 = vld [vmem:[%s462_s1] sm:$0xff]  ;;  %s396_s1 = smov [#allocation6]  }
  0x18   :  { %294 = vmatpush3.bf16.msra.mxu0 %v291_v11  ;;  %s246_s5 = sshll.u32 %s396_s1, 4  ;;  %s247_s5 = int_to_ptr.vmem [resolvable:$true] %s246_s5 }
  0x19   :  { %323 = vset.pattern.permute.xlu1 %v388_v3  ;;  %321 = vset.pattern.permute.xlu0 %v388_v3  ;;  %s358_s6 = scalar_lea.vmem %s247_s5, 256  ;;  %p363_p9 = scmp.lt.s32.totalorder %s247_s5, %s247_s5 }
  0x1a   :  { %54 = vperm.xlu1 %323, %v41_v1   ;;  %51 = vperm.xlu0 %321, %v40_v2   ;;  %p359_p8 = scmp.ne.s32.totalorder %s247_s5, %s358_s6  ;;  %p364_p10 = scmp.lt.s32.totalorder %s358_s6, %s358_s6 }
  0x1b   :  { %296 = vmatprep.subr.bf16.mxu0 %v295_v15 }
  0x1c   :  { %298 = vmatpush3.bf16.msra.mxu0 %v295_v15  ;;  %p365_p11 = por %p364_p10, %p363_p9 }
  0x1d   :  { %300 = vmatprep.subr.bf16.mxu0 %v299_v18 }
  0x1e   :  { %324 = vset.pattern.permute.xlu1 %v389_v4  ;;  %325 = vset.pattern.permute.xlu0 %v389_v4  ;;  %p366_p12 = pnand %p365_p11, %p359_p8 }
  0x1f   :  { %61 = vperm.xlu1 %324, %v40_v2   ;;  %64 = vperm.xlu0 %325, %v41_v1  }
  0x20   :  { %302 = vmatpush3.bf16.msra.mxu0 %v299_v18 }
  0x21   :  { %304 = vmatprep.subr.bf16.mxu0 %v303_v21 }
  0x23   :  { %326 = vset.pattern.permute.xlu1 %v390_v5  ;;  %327 = vset.pattern.permute.xlu0 %v391_v6 }
  0x24   :  { %71 = vperm.xlu1 %326, %v40_v2   ;;  %81 = vperm.xlu0 %327, %v40_v2  }
  0x25   :  { %306 = vmatpush3.bf16.msra.mxu0 %v303_v21 }
  0x28   :  { %74 = vperm.xlu1 %326, %v41_v1   ;;  %330 = vset.pattern.permute.xlu0 %v392_v7 }
  0x29   :  { %94 = vperm.xlu0 %330, %v41_v1  }
  0x2c   :  { %328 = vset.pattern.permute.xlu1 %v391_v6 }
  0x2d   :  { %84 = vperm.xlu1 %328, %v41_v1   ;;  %332 = vset.pattern.permute.xlu0 %v393_v8 }
  0x2e   :  { %111 = vperm.xlu0 %332, %v40_v2  }
  0x31   :  { %329 = vset.pattern.permute.xlu1 %v392_v7 }
  0x32   :  { %91 = vperm.xlu1 %329, %v40_v2   ;;  %335 = vset.pattern.permute.xlu0 %v387_v0 }
  0x33   :  { %234 = vperm.xlu0 %335, %v226_v22  }
  0x36   :  { %331 = vset.pattern.permute.xlu1 %v394_v14 }
  0x37   :  { %101 = vperm.xlu1 %331, %v40_v2  }
  0x3b   :  { %104 = vperm.xlu1 %331, %v41_v1  }
  0x3f   :  { %333 = vset.pattern.permute.xlu1 %v393_v8 }
  0x40   :  { %114 = vperm.xlu1 %333, %v41_v1  }
  0x44   :  { %334 = vset.pattern.permute.xlu1 %v387_v0 }
  0x45   :  { %229 = vperm.xlu1 %334, %v225_v23  }
  0x94   :  { %v47_v24 = vpop.permute.xlu1 %46  ;;  %v44_v26 = vpop.permute.xlu0 %43 }
  0x95   :  { %vm48_vm0 = vcmp.eq.s32.totalorder %v44_v26, %v36_v33  ;;  %vm49_vm9 = vcmp.eq.s32.totalorder %v47_v24, %v36_v33 }
  0x99   :  { %v55_v25 = vpop.permute.xlu1 %54  ;;  %v52_v28 = vpop.permute.xlu0 %51 }
  0x9a   :  { %vm56_vm1 = vcmp.eq.s32.totalorder %v52_v28, %v36_v33  ;;  %vm57_vm5 = vcmp.eq.s32.totalorder %v55_v25, %v36_v33 }
  0x9b   :  { %vm58_vm2 = vmor %vm48_vm0, %vm56_vm1 }
  0x9c   :  { %vm59_vm11 = vmor %vm49_vm9, %vm57_vm5 }
  0x9e   :  { %v62_v27 = vpop.permute.xlu1 %61  ;;  %v65_v31 = vpop.permute.xlu0 %64 }
  0x9f   :  { %vm66_vm3 = vcmp.eq.s32.totalorder %v62_v27, %v36_v33  ;;  %vm67_vm14 = vcmp.eq.s32.totalorder %v65_v31, %v36_v33 }
  0xa0   :  { %vm68_vm6 = vmor %vm58_vm2, %vm66_vm3  ;;  %vm134_vm3 = vcmask 523264  }
  0xa1   :  { %vm69_vm5 = vmor %vm59_vm11, %vm67_vm14 }
  0xa3   :  { %v72_v29 = vpop.permute.xlu1 %71  ;;  %v82_v34 = vpop.permute.xlu0 %81 }
  0xa4   :  { %vm76_vm4 = vcmp.eq.s32.totalorder %v72_v29, %v36_v33  ;;  %vm86_vm8 = vcmp.eq.s32.totalorder %v82_v34, %v36_v33 }
  0xa5   :  { %vm78_vm7 = vmor %vm68_vm6, %vm76_vm4 }
  0xa6   :  { %vm88_vm12 = vmor %vm78_vm7, %vm86_vm8 }
  0xa7   :  { %v75_v32 = vpop.permute.xlu1 %74 }
  0xa8   :  { %v95_v36 = vpop.permute.xlu0 %94  ;;  %vm77_vm1 = vcmp.eq.s32.totalorder %v75_v32, %v36_v33 }
  0xa9   :  { %vm79_vm9 = vmor %vm69_vm5, %vm77_vm1  ;;  %vm97_vm8 = vcmp.eq.s32.totalorder %v95_v36, %v36_v33 }
  0xac   :  { %v85_v35 = vpop.permute.xlu1 %84 }
  0xad   :  { %v112_v38 = vpop.permute.xlu0 %111  ;;  %vm87_vm4 = vcmp.eq.s32.totalorder %v85_v35, %v36_v33 }
  0xae   :  { %vm116_vm13 = vcmp.eq.s32.totalorder %v112_v38, %v36_v33  ;;  %vm89_vm7 = vmor %vm79_vm9, %vm87_vm4 }
  0xb1   :  { %v92_v37 = vpop.permute.xlu1 %91 }
  0xb2   :  { %vm96_vm10 = vcmp.eq.s32.totalorder %v92_v37, %v36_v33  ;;  %v235_v45 = vpop.permute.xlu0 %234 }
  0xb3   :  { %vm98_vm15 = vmor %vm88_vm12, %vm96_vm10 }
  0xb4   :  { %vm99_vm12 = vmor %vm89_vm7, %vm97_vm8 }
  0xb6   :  { %v102_v39 = vpop.permute.xlu1 %101 }
  0xb7   :  { %vm106_vm0 = vcmp.eq.s32.totalorder %v102_v39, %v36_v33 }
  0xb8   :  { %vm108_vm2 = vmor %vm98_vm15, %vm106_vm0 }
  0xb9   :  { %vm118_vm6 = vmor %vm108_vm2, %vm116_vm13 }
  0xba   :  { %v105_v40 = vpop.permute.xlu1 %104  ;;  %v258_v42 = vsel %vm118_vm6, 1.0, %v395_v41 }
  0xbb   :  { %288 = vmatprep.mubr.msk.f32.mxu0 %vm134_vm3, %v258_v42  ;;  %vm107_vm10 = vcmp.eq.s32.totalorder %v105_v40, %v36_v33 }
  0xbc   :  { %vm109_vm0 = vmor %vm99_vm12, %vm107_vm10 }
  0xbf   :  { %v115_v43 = vpop.permute.xlu1 %114 }
  0xc0   :  { %vm117_vm15 = vcmp.eq.s32.totalorder %v115_v43, %v36_v33 }
  0xc1   :  { %vm119_vm2 = vmor %vm109_vm0, %vm117_vm15 }
  0xc2   :  { %v259_v44 = vsel %vm119_vm2, 1.0, %v395_v41 }
  0xc3   :  { %289 = vmatmul.mubr.msk.f32.vlgmr.msra.gmra.mrb[0].mxu0 %vm134_vm3, %v259_v44 }
  0xc4   :  { %v230_v46 = vpop.permute.xlu1 %229 }
 0x196   :  { %v290_v47 = vpop.f32.mrb[0].mxu0 }
 0x197   :  { %v238_v48 = vmul.f32 %v290_v47, %v235_v45  ;;  %v207_v49 = vpop.f32.mrb[1].mxu0 }
 0x198   :  { %v237_v50 = vmul.f32 %v230_v46, %v207_v49 }
 0x199   :  { %240 = vst [vmem:[#allocation6 + $0x8] sm:$0xff] %v238_v48 }
 0x19a   :  { %239 = vst [vmem:[#allocation6] sm:$0xff] %v237_v50 }
 0x19b   :  { %369 = shalt.err (!%p366_p12)
}
 0x19c   :  { %s370_s9 = scalar_lea.hbm %s464_s3, 256 }
 0x19d   :  { %p371_p13 = scmp.ne.s32.totalorder %s464_s3, %s370_s9  ;;  %p374_p0 = scmp.lt.u32.totalorder %s370_s9, %s464_s3 }
 0x19f   :  { %p376_p1 = pnand %p374_p0, %p371_p13 }
 0x1a1   :  { %379 = shalt.err (!%p376_p1)
}
 0x1a2   :  { %252 = dma.vmem_to_hbm [thread:$0]  %s247_s5, 256, %s464_s3, [#allocation5], %s385_s22, %s385_s22, %s386_s23  }
 0x1a3   :  { %382 = dma.done.wait [#allocation5], 256  }
 0x1a4   :  { %383 = vsyncadd [#allocation5], 4294967040 }
 0x1a5   :  { %256 = vsyncpa [#allocation4], 1 }
 0x1a6   :  { %257 = vsyncpa [#allocation5], 1 }

</bundles_post_ra>
